<compile_context>
chip_gen: v7x
topology: tpu7x:2x2x1
jax: 0.10.0
libtpu: 0.0.40
codegen_flags: <defaults>
</compile_context>

<pallas_src>
import functools

import jax
import jax.numpy as jnp
from jax.experimental import pallas as pl
from jax.experimental.pallas import tpu as pltpu


def _dqn_kernel(x_ref, w1_ref, b1_ref, w2_ref, b2_ref, w3_ref, b3_ref, o_ref):
    # Cast the activation tile to the matmul compute dtype inside the kernel
    # (avoids an un-hidden wrapper-side convert op + extra HBM copy of x).
    x = x_ref[...].astype(w1_ref.dtype)

    # Layer 1: (TM, S) @ (S, H) -> f32 accumulate, bias + ReLU in f32.
    h1 = jnp.dot(x, w1_ref[...], preferred_element_type=jnp.float32)
    h1 = jnp.maximum(h1 + b1_ref[...], 0.0).astype(w2_ref.dtype)

    # Layer 2: (TM, H) @ (H, H)
    h2 = jnp.dot(h1, w2_ref[...], preferred_element_type=jnp.float32)
    h2 = jnp.maximum(h2 + b2_ref[...], 0.0).astype(w3_ref.dtype)

    # Output head (no activation); lane-dense (padded-to-128) output block.
    out = jnp.dot(h2, w3_ref[...], preferred_element_type=jnp.float32) + b3_ref[...]
    o_ref[...] = out.astype(o_ref.dtype)


@functools.partial(
    jax.jit, static_argnames=("n_actions", "block_batch", "store_dtype"))
def dqn_forward(x, w1, b1, w2, b2, w3p, b3p, *,
                n_actions, block_batch=None, store_dtype=jnp.bfloat16):
    """Forward pass. Weights must come from prepare_dqn_params (pre-padded head,
    bf16 weights, f32 biases). Returns f32 Q-values of shape (batch, n_actions)."""
    batch, state_dim = x.shape
    n_neurons = w1.shape[1]
    n_pad = w3p.shape[1]          # action head already padded to a multiple of 128

    # ---- batch tile: as few grid steps as possible (overhead-bound kernel) ----
    # Default: 1 tile for small batches (best for single-TC v5e/v6e), 2 parallel
    # tiles once the batch is big enough to feed both TensorCores on v7x.
    if block_batch is None:
        target_steps = 2 if batch >= 512 else 1
        block_batch = -(-batch // target_steps)
    # Multiple of 16 satisfies both the f32 (8) and bf16 (16) sublane rules.
    tm = max(16, ((block_batch + 15) // 16) * 16)
    nb = pl.cdiv(batch, tm)       # ragged last tile handled by Pallas (rows independent)

    # ---- advisory cost estimate (real work, not padded) ----
    flops = 2 * batch * (state_dim * n_neurons
                         + n_neurons * n_neurons
                         + n_neurons * n_actions)
    bytes_accessed = (
        x.size * x.dtype.itemsize
        + sum(a.size * a.dtype.itemsize for a in (w1, b1, w2, b2, w3p, b3p))
        + batch * n_pad * jnp.dtype(store_dtype).itemsize)

    # Activations stream over the batch grid axis; weights/biases use constant
    # index maps (VMEM-resident) and are single-buffered (no second pipeline
    # buffer needed for constant-index operands).
    act_spec = pl.BlockSpec((tm, state_dim), lambda i: (i, 0))
    out_spec = pl.BlockSpec((tm, n_pad), lambda i: (i, 0))

    def resident(arr):
        return pl.BlockSpec(arr.shape, lambda i: (0, 0),
                            pipeline_mode=pl.Buffered(1))

    out_padded = pl.pallas_call(
        _dqn_kernel,
        out_shape=jax.ShapeDtypeStruct((batch, n_pad), store_dtype),
        grid=(nb,),
        in_specs=[
            act_spec,
            resident(w1), resident(b1),
            resident(w2), resident(b2),
            resident(w3p), resident(b3p),
        ],
        out_specs=out_spec,
        compiler_params=pltpu.CompilerParams(
            dimension_semantics=("parallel",),
        ),
        cost_estimate=pl.CostEstimate(
            flops=flops, transcendentals=0, bytes_accessed=bytes_accessed),
    )(x, w1, b1, w2, b2, w3p, b3p)

    # Strip the lane padding on the action head; present f32 Q-values.
    return out_padded[:, :n_actions].astype(jnp.float32)


def prepare_dqn_params(w1, b1, w2, b2, w3, b3, compute_dtype=jnp.bfloat16):
    """One-time prep (call once, outside the hot loop): pad the action head to a
    lane-dense multiple of 128, cast matmul operands to bf16, biases to f32."""
    n_actions = w3.shape[1]
    n_pad = ((n_actions + 127) // 128) * 128
    w3p = jnp.pad(w3, ((0, 0), (0, n_pad - n_actions)))
    b3p = jnp.pad(b3, ((0, 0), (0, n_pad - n_actions)))
    cd = compute_dtype
    return (w1.astype(cd), b1.astype(jnp.float32),
            w2.astype(cd), b2.astype(jnp.float32),
            w3p.astype(cd), b3p.astype(jnp.float32))


def init_dqn_params(key, state_dim, n_actions, n_neurons):
    """Mirror PyTorch Linear default init: U(-1/sqrt(fan_in), 1/sqrt(fan_in))."""
    ks = jax.random.split(key, 6)

    def linear(kw, kb, fan_in, fan_out):
        bound = 1.0 / jnp.sqrt(jnp.float32(fan_in))
        w = jax.random.uniform(kw, (fan_in, fan_out), jnp.float32, -bound, bound)
        b = jax.random.uniform(kb, (1, fan_out), jnp.float32, -bound, bound)
        return w, b

    w1, b1 = linear(ks[0], ks[1], state_dim, n_neurons)
    w2, b2 = linear(ks[2], ks[3], n_neurons, n_neurons)
    w3, b3 = linear(ks[4], ks[5], n_neurons, n_actions)
    return w1, b1, w2, b2, w3, b3


def dqn_reference(x, w1, b1, w2, b2, w3, b3, compute_dtype=jnp.bfloat16):
    """Pure-JAX reference mirroring the kernel's bf16-operand / f32-accumulate math."""
    cd = compute_dtype
    h1 = jnp.dot(x.astype(cd), w1.astype(cd), preferred_element_type=jnp.float32) + b1
    h1 = jnp.maximum(h1, 0.0)
    h2 = jnp.dot(h1.astype(cd), w2.astype(cd), preferred_element_type=jnp.float32) + b2
    h2 = jnp.maximum(h2, 0.0)
    return jnp.dot(h2.astype(cd), w3.astype(cd), preferred_element_type=jnp.float32) + b3


def dqn_reference_f32(x, w1, b1, w2, b2, w3, b3):
    h1 = jnp.maximum(x @ w1 + b1, 0.0)
    h2 = jnp.maximum(h1 @ w2 + b2, 0.0)
    return h2 @ w3 + b3


if __name__ == "__main__":
    key = jax.random.PRNGKey(0)
    k_params, k_x = jax.random.split(key)

    # Small shapes implied by the module: a vector state, small MLP, few actions.
    batch = 32
    state_dim = 8
    n_neurons = 32
    n_actions = 4

    raw_params = init_dqn_params(k_params, state_dim, n_actions, n_neurons)
    prepared = prepare_dqn_params(*raw_params)
    x = jax.random.normal(k_x, (batch, state_dim), jnp.float32)

    ref_bf16 = dqn_reference(x, *raw_params)

    # 1) Exact-store path (f32 output), single batch tile (grid=(1,)).
    out_f32 = dqn_forward(x, *prepared, n_actions=n_actions,
                          store_dtype=jnp.float32)
    out_f32 = jax.block_until_ready(out_f32)
    assert out_f32.shape == (batch, n_actions)
    assert jnp.allclose(out_f32, ref_bf16, atol=2e-3, rtol=2e-3)

    # 2) Default path: bf16 output store (halved writeback), same math.
    out_bf16 = jax.block_until_ready(
        dqn_forward(x, *prepared, n_actions=n_actions))
    assert out_bf16.shape == (batch, n_actions)
    assert jnp.allclose(out_bf16, ref_bf16, atol=1.5e-2, rtol=1.5e-2)

    # 3) Multi-tile grid path (2 parallel steps, as used for large batches / v7x).
    out_2tile = jax.block_until_ready(
        dqn_forward(x, *prepared, n_actions=n_actions, block_batch=16))
    assert jnp.allclose(out_2tile, out_bf16, atol=1e-5, rtol=1e-5)

    # 4) Loose sanity check vs pure-f32 math (bf16 operand rounding only).
    ref_f32 = dqn_reference_f32(x, *raw_params)
    assert jnp.allclose(out_f32, ref_f32, atol=5e-2, rtol=5e-2)

    print("KERNEL_OK")
</pallas_src>

<mosaic_0001>
module attributes {stable_mosaic.version = 11 : i64} {
  func.func @_dqn_kernel(%arg0: i32, %arg1: memref<32x8xf32, #tpu.memory_space<vmem>>, %arg2: memref<8x32xbf16, #tpu.memory_space<vmem>>, %arg3: memref<1x32xf32, #tpu.memory_space<vmem>>, %arg4: memref<32x32xbf16, #tpu.memory_space<vmem>>, %arg5: memref<1x32xf32, #tpu.memory_space<vmem>>, %arg6: memref<32x128xbf16, #tpu.memory_space<vmem>>, %arg7: memref<1x128xf32, #tpu.memory_space<vmem>>, %arg8: memref<32x128xf32, #tpu.memory_space<vmem>>) attributes {dimension_semantics = [#tpu.dimension_semantics<parallel>], iteration_bounds = array<i64: 1>, scalar_prefetch = 0 : i64, scratch_operands = 0 : i64, tpu.core_type = #tpu.core_type<tc>, window_params = [{transform_indices = @transform_0, window_bounds = array<i64: 32, 8>}, {pipeline_mode = #tpu.pipeline_mode<synchronous>, transform_indices = @transform_1, window_bounds = array<i64: 8, 32>}, {pipeline_mode = #tpu.pipeline_mode<synchronous>, transform_indices = @transform_2, window_bounds = array<i64: 1, 32>}, {pipeline_mode = #tpu.pipeline_mode<synchronous>, transform_indices = @transform_3, window_bounds = array<i64: 32, 32>}, {pipeline_mode = #tpu.pipeline_mode<synchronous>, transform_indices = @transform_4, window_bounds = array<i64: 1, 32>}, {pipeline_mode = #tpu.pipeline_mode<synchronous>, transform_indices = @transform_5, window_bounds = array<i64: 32, 128>}, {pipeline_mode = #tpu.pipeline_mode<synchronous>, transform_indices = @transform_6, window_bounds = array<i64: 1, 128>}, {transform_indices = @transform_7, window_bounds = array<i64: 32, 128>}]} {
    %c0 = arith.constant 0 : index
    %c0_0 = arith.constant 0 : index
    %0 = vector.load %arg1[%c0, %c0_0] : memref<32x8xf32, #tpu.memory_space<vmem>>, vector<32x8xf32>
    %1 = arith.truncf %0 : vector<32x8xf32> to vector<32x8xbf16>
    %c0_1 = arith.constant 0 : index
    %c0_2 = arith.constant 0 : index
    %2 = vector.load %arg2[%c0_1, %c0_2] : memref<8x32xbf16, #tpu.memory_space<vmem>>, vector<8x32xbf16>
    %cst = arith.constant dense<0.000000e+00> : vector<32x32xf32>
    %3 = tpu.matmul %1, %2, %cst {dimension_numbers = #tpu.dot_dimension_numbers<[1], [0], [0], [1], [0, 0, 1, 1], [], []>} : vector<32x8xbf16>, vector<8x32xbf16>, vector<32x32xf32> -> vector<32x32xf32>
    %c0_3 = arith.constant 0 : index
    %c0_4 = arith.constant 0 : index
    %4 = vector.load %arg3[%c0_3, %c0_4] : memref<1x32xf32, #tpu.memory_space<vmem>>, vector<1x32xf32>
    %5 = vector.broadcast %4 : vector<1x32xf32> to vector<32x32xf32>
    %6 = arith.addf %3, %5 : vector<32x32xf32>
    %cst_5 = arith.constant 0.000000e+00 : f32
    %7 = vector.broadcast %cst_5 : f32 to vector<32x32xf32>
    %8 = arith.maximumf %6, %7 : vector<32x32xf32>
    %9 = arith.truncf %8 : vector<32x32xf32> to vector<32x32xbf16>
    %c0_6 = arith.constant 0 : index
    %c0_7 = arith.constant 0 : index
    %10 = vector.load %arg4[%c0_6, %c0_7] : memref<32x32xbf16, #tpu.memory_space<vmem>>, vector<32x32xbf16>
    %cst_8 = arith.constant dense<0.000000e+00> : vector<32x32xf32>
    %11 = tpu.matmul %9, %10, %cst_8 {dimension_numbers = #tpu.dot_dimension_numbers<[1], [0], [0], [1], [0, 0, 1, 1], [], []>} : vector<32x32xbf16>, vector<32x32xbf16>, vector<32x32xf32> -> vector<32x32xf32>
    %c0_9 = arith.constant 0 : index
    %c0_10 = arith.constant 0 : index
    %12 = vector.load %arg5[%c0_9, %c0_10] : memref<1x32xf32, #tpu.memory_space<vmem>>, vector<1x32xf32>
    %13 = vector.broadcast %12 : vector<1x32xf32> to vector<32x32xf32>
    %14 = arith.addf %11, %13 : vector<32x32xf32>
    %cst_11 = arith.constant 0.000000e+00 : f32
    %15 = vector.broadcast %cst_11 : f32 to vector<32x32xf32>
    %16 = arith.maximumf %14, %15 : vector<32x32xf32>
    %17 = arith.truncf %16 : vector<32x32xf32> to vector<32x32xbf16>
    %c0_12 = arith.constant 0 : index
    %c0_13 = arith.constant 0 : index
    %18 = vector.load %arg6[%c0_12, %c0_13] : memref<32x128xbf16, #tpu.memory_space<vmem>>, vector<32x128xbf16>
    %cst_14 = arith.constant dense<0.000000e+00> : vector<32x128xf32>
    %19 = tpu.matmul %17, %18, %cst_14 {dimension_numbers = #tpu.dot_dimension_numbers<[1], [0], [0], [1], [0, 0, 1, 1], [], []>} : vector<32x32xbf16>, vector<32x128xbf16>, vector<32x128xf32> -> vector<32x128xf32>
    %c0_15 = arith.constant 0 : index
    %c0_16 = arith.constant 0 : index
    %20 = vector.load %arg7[%c0_15, %c0_16] : memref<1x128xf32, #tpu.memory_space<vmem>>, vector<1x128xf32>
    %21 = vector.broadcast %20 : vector<1x128xf32> to vector<32x128xf32>
    %22 = arith.addf %19, %21 : vector<32x128xf32>
    %c0_17 = arith.constant 0 : index
    %c0_18 = arith.constant 0 : index
    %23 = vector.load %arg8[%c0_17, %c0_18] : memref<32x128xf32, #tpu.memory_space<vmem>>, vector<32x128xf32>
    tpu.vector_store %arg8[%c0_17, %c0_18], %22 {strides = array<i32>} : memref<32x128xf32, #tpu.memory_space<vmem>>, vector<32x128xf32>,
    return
  }
  func.func @transform_0(%arg0: i32) -> (i32, i32) {
    %c0_i32 = arith.constant 0 : i32
    %c0_i32_0 = arith.constant 0 : i32
    return %arg0, %c0_i32 : i32, i32
  }
  func.func @transform_1(%arg0: i32) -> (i32, i32) {
    %c0_i32 = arith.constant 0 : i32
    %c0_i32_0 = arith.constant 0 : i32
    %c0_i32_1 = arith.constant 0 : i32
    return %c0_i32, %c0_i32_0 : i32, i32
  }
  func.func @transform_2(%arg0: i32) -> (i32, i32) {
    %c0_i32 = arith.constant 0 : i32
    %c0_i32_0 = arith.constant 0 : i32
    %c0_i32_1 = arith.constant 0 : i32
    return %c0_i32, %c0_i32_0 : i32, i32
  }
  func.func @transform_3(%arg0: i32) -> (i32, i32) {
    %c0_i32 = arith.constant 0 : i32
    %c0_i32_0 = arith.constant 0 : i32
    %c0_i32_1 = arith.constant 0 : i32
    return %c0_i32, %c0_i32_0 : i32, i32
  }
  func.func @transform_4(%arg0: i32) -> (i32, i32) {
    %c0_i32 = arith.constant 0 : i32
    %c0_i32_0 = arith.constant 0 : i32
    %c0_i32_1 = arith.constant 0 : i32
    return %c0_i32, %c0_i32_0 : i32, i32
  }
  func.func @transform_5(%arg0: i32) -> (i32, i32) {
    %c0_i32 = arith.constant 0 : i32
    %c0_i32_0 = arith.constant 0 : i32
    %c0_i32_1 = arith.constant 0 : i32
    return %c0_i32, %c0_i32_0 : i32, i32
  }
  func.func @transform_6(%arg0: i32) -> (i32, i32) {
    %c0_i32 = arith.constant 0 : i32
    %c0_i32_0 = arith.constant 0 : i32
    %c0_i32_1 = arith.constant 0 : i32
    return %c0_i32, %c0_i32_0 : i32, i32
  }
  func.func @transform_7(%arg0: i32) -> (i32, i32) {
    %c0_i32 = arith.constant 0 : i32
    %c0_i32_0 = arith.constant 0 : i32
    return %arg0, %c0_i32 : i32, i32
  }
}

</mosaic_0001>

<bundles_post_ra>
// kernel: dqn_forward.1
= control target key start
LH: loop header
LB: loop body
LE: loop exit
PB: predicated region body
PF: predicated region fallthrough
CT: control target
= control target key end

     0   :  { %vm48_vm0 = vcmask 1043456   ;;  %vm41_vm1 = vcmask 64512   ;;  %vm130_vm2 = vcmask 261120   ;;  %s421_s1 = inlined_call_operand.vmem [shape: bf16[8,32], index: 1, kind: input, shape index: {}]   ;;  %s422_s0 = inlined_call_operand.vmem [shape: f32[32,8], index: 0, kind: input, shape index: {}]   ;;  %s423_s3 = inlined_call_operand.vmem [shape: bf16[32,32], index: 3, kind: input, shape index: {}]   ;;  %s424_s2 = inlined_call_operand.vmem [shape: f32[1,32], index: 2, kind: input, shape index: {}]   ;;  %s425_s5 = inlined_call_operand.vmem [shape: bf16[32,128], index: 5, kind: input, shape index: {}]   ;;  %s426_s4 = inlined_call_operand.vmem [shape: f32[1,32], index: 4, kind: input, shape index: {}]   ;;  %s427_s6 = inlined_call_operand.vmem [shape: f32[1,128], index: 6, kind: input, shape index: {}]   ;;  %s428_s7 = inlined_call_operand.vmem [shape: f32[32,128], index: 7, kind: output, shape index: {}]  }
   0x1   :  { %v33_v0 = vld [vmem:[%s421_s1] sm:$0xf]  ;;  %v28_v2 = vld [vmem:[%s422_s0 + $0x8] sm:$0xff]  ;;  %v29_v5 = vld [vmem:[%s422_s0 + $0x10] sm:$0xff] }
   0x2   :  { %v27_v1 = vld [vmem:[%s422_s0] sm:$0xff]  ;;  %324 = vmatprep.subr.msk.bf16.mxu0 %vm48_vm0, %v33_v0  ;;  %v50_v3 = vsel %vm48_vm0, %v33_v0, 0  ;;  %v30_v6 = vld [vmem:[%s422_s0 + $0x18] sm:$0xff]  ;;  %v326_v9 = vld [vmem:[%s423_s3 + $0x8] sm:$0xff]  }
   0x3   :  { %v31_v4 = vpack.c.bf16 %v28_v2, %v27_v1  ;;  %303 = vmatpush3.bf16.msra.mxu0 %v50_v3  ;;  %v32_v7 = vpack.c.bf16 %v30_v6, %v29_v5  ;;  %v325_v8 = vld [vmem:[%s423_s3] sm:$0xff]   ;;  %v328_v26 = vld [vmem:[%s425_s5 + $0x8] sm:$0xff]  }
   0x4   :  { %308 = vmatprep.subr.bf16.mxu1 %v325_v8  ;;  %v278_v10 = vld [vmem:[%s424_s2] ss:$0 sm:$0xff] }
   0x5   :  { %304 = vmatprep.mubr.msk.bf16.mxu0 %vm41_vm1, %v31_v4  ;;  %309 = vmatpush3.bf16.msra.mxu1 %v325_v8  ;;  %v327_v25 = vld [vmem:[%s425_s5] sm:$0xff]  }
   0x6   :  { %305 = vmatmul.mubr.msk.bf16.vlgmr.msra.gmra.mrb[0].mxu0 %vm41_vm1, %v32_v7  ;;  %310 = vmatprep.subr.bf16.mxu1 %v326_v9  ;;  %v281_v27 = vld [vmem:[%s426_s4] ss:$0 sm:$0xff] }
   0x7   :  { %316 = vmatprep.subr.bf16.mxu0 %v327_v25  ;;  %v286_v42 = vld [vmem:[%s427_s6] ss:$0 sm:$0xff] }
   0x8   :  { %317 = vmatpush3.bf16.msra.mxu0 %v327_v25 }
   0x9   :  { %311 = vmatpush3.bf16.msra.mxu1 %v326_v9  ;;  %318 = vmatprep.subr.bf16.mxu0 %v328_v26 }
   0xc   :  { %319 = vmatpush3.bf16.msra.mxu0 %v328_v26 }
  0xd9   :  { %v306_v11 = vpop.f32.mrb[0].mxu0 }
  0xda   :  { %v95_v12 = vadd.f32 %v306_v11, %v278_v10  ;;  %v86_v13 = vpop.f32.mrb[1].mxu0 }
  0xdb   :  { %v87_v14 = vadd.f32 %v278_v10, %v86_v13  ;;  %v307_v15 = vpop.f32.mrb[2].mxu0 }
  0xdc   :  { %v98_v16 = vadd.f32 %v307_v15, %v278_v10  ;;  %v89_v17 = vpop.f32.mrb[3].mxu0  ;;  %v103_v19 = vmax.f32 %v95_v12, 0.0 }
  0xdd   :  { %v90_v18 = vadd.f32 %v278_v10, %v89_v17  ;;  %v101_v21 = vmax.f32 %v87_v14, 0.0 }
  0xde   :  { %v104_v20 = vmax.f32 %v98_v16, 0.0 }
  0xdf   :  { %v102_v22 = vmax.f32 %v90_v18, 0.0 }
  0xe0   :  { %v106_v23 = vpack.c.bf16 %v104_v20, %v103_v19 }
  0xe1   :  { %v105_v24 = vpack.c.bf16 %v102_v22, %v101_v21 }
  0xe3   :  { %312 = vmatprep.mubr.msk.bf16.mxu1 %vm130_vm2, %v105_v24 }
  0xe4   :  { %313 = vmatmul.mubr.msk.bf16.vlgmr.msra.gmra.mrb[0].mxu1 %vm130_vm2, %v106_v23 }
 0x1b7   :  { %v314_v28 = vpop.f32.mrb[0].mxu1 }
 0x1b8   :  { %v180_v29 = vadd.f32 %v314_v28, %v281_v27  ;;  %v171_v30 = vpop.f32.mrb[1].mxu1 }
 0x1b9   :  { %v172_v31 = vadd.f32 %v281_v27, %v171_v30  ;;  %v315_v32 = vpop.f32.mrb[2].mxu1 }
 0x1ba   :  { %v183_v33 = vadd.f32 %v315_v32, %v281_v27  ;;  %v174_v34 = vpop.f32.mrb[3].mxu1  ;;  %v188_v36 = vmax.f32 %v180_v29, 0.0 }
 0x1bb   :  { %v175_v35 = vadd.f32 %v281_v27, %v174_v34  ;;  %v186_v38 = vmax.f32 %v172_v31, 0.0 }
 0x1bc   :  { %v189_v37 = vmax.f32 %v183_v33, 0.0 }
 0x1bd   :  { %v187_v39 = vmax.f32 %v175_v35, 0.0 }
 0x1be   :  { %v191_v40 = vpack.c.bf16 %v189_v37, %v188_v36 }
 0x1bf   :  { %v190_v41 = vpack.c.bf16 %v187_v39, %v186_v38 }
 0x1c1   :  { %320 = vmatprep.mubr.msk.bf16.mxu0 %vm130_vm2, %v190_v41 }
 0x1c2   :  { %321 = vmatmul.mubr.msk.bf16.vlgmr.msra.gmra.mrb[4].mxu0 %vm130_vm2, %v191_v40 }
 0x295   :  { %v322_v43 = vpop.f32.mrb[4].mxu0 }
 0x296   :  { %v264_v44 = vadd.f32 %v322_v43, %v286_v42  ;;  %v255_v45 = vpop.f32.mrb[5].mxu0 }
 0x297   :  { %v256_v46 = vadd.f32 %v286_v42, %v255_v45  ;;  %v323_v47 = vpop.f32.mrb[6].mxu0 }
 0x298   :  { %272 = vst [vmem:[%s428_s7 + $0x10] sm:$0xff] %v264_v44  ;;  %v267_v48 = vadd.f32 %v323_v47, %v286_v42  ;;  %v258_v49 = vpop.f32.mrb[7].mxu0 }
 0x299   :  { %270 = vst [vmem:[%s428_s7] sm:$0xff] %v256_v46  ;;  %v259_v50 = vadd.f32 %v286_v42, %v258_v49 }
 0x29a   :  { %273 = vst [vmem:[%s428_s7 + $0x18] sm:$0xff] %v267_v48 }
 0x29b   :  { %271 = vst [vmem:[%s428_s7 + $0x8] sm:$0xff] %v259_v50 }

</bundles_post_ra>
